<compile_context>
chip_gen: v5e
topology: v5e:2x2
jax: 0.10.0
libtpu: 0.0.40
codegen_flags: <defaults>
</compile_context>

<pallas_src>
import functools

import numpy as np
import jax
import jax.numpy as jnp
from jax import lax
from jax.experimental import pallas as pl
from jax.experimental.pallas import tpu as pltpu


def _contrastive_loss_kernel(xt_ref, out_ref, acc_ref, *,
                             margin, eps, nq, tuples_per_block, nb_per_split):
    """xt_ref: (TB, S, dim) f32, out_ref: (1, 1, 1) f32, acc_ref: (1, 1, 1) f32 VMEM."""
    c = pl.program_id(0)          # core split ("parallel")
    b = pl.program_id(1)          # tuple-block within the split ("arbitrary" reduction)

    @pl.when(b == 0)
    def _init():
        acc_ref[...] = jnp.zeros_like(acc_ref)

    x = xt_ref[...]                                          # (TB, S, dim)
    q = x[:, 0:1, :]                                         # (TB, 1, dim) query rows
    dif = x - q                                              # row j == 0 is all-zero
    d2 = jnp.sum(dif * dif, axis=2, keepdims=True) + eps     # (TB, S, 1)
    d = jnp.sqrt(d2)                                         # EUP
    hinge = jnp.maximum(margin - d, 0.0)

    # In-tuple position j: 0 = query (skip), 1 = positive, >= 2 = negative.
    j = lax.broadcasted_iota(jnp.int32, d2.shape, 1)
    y = jnp.where(j == 1, 0.5 * d2, 0.5 * hinge * hinge)     # (TB, S, 1)

    # Mask the query self-pair and tuples past nq (partial / clamped trailing blocks).
    t = lax.broadcasted_iota(jnp.int32, d2.shape, 0)
    g_tuple = (c * nb_per_split + b) * tuples_per_block + t
    y = jnp.where((j == 0) | (g_tuple >= nq), 0.0, y)

    acc_ref[...] += jnp.sum(y, keepdims=True)                # (1, 1, 1)

    @pl.when(b == nb_per_split - 1)
    def _finalize():
        out_ref[...] = acc_ref[...]                          # single writeback per split


def contrastive_loss(x, label, margin=0.7, eps=1e-6,
                     max_block_bytes=4 * 1024 * 1024):
    """x: (dim, N) float, label: (N,) with -1 query / 1 positive / 0 negative."""
    x = jnp.asarray(x, jnp.float32)
    label_np = np.asarray(label, np.float32)
    dim, n = x.shape

    nq = int((label_np == -1).sum())          # number of tuples
    S = n // nq                               # images per tuple (q + p + negatives)
    assert nq * S == n, "label / tuple layout mismatch"

    # The kernel derives lbl from the in-tuple position, which requires the canonical
    # [q, p, n1, ..., nK] packing promised by the module docstring.
    expected = np.tile(
        np.concatenate([np.array([-1.0, 1.0], np.float32),
                        np.zeros(S - 2, np.float32)]), nq)
    assert np.array_equal(label_np, expected), (
        "contrastive_loss kernel expects tuples packed as [q, p, n1, ..., nK]")

    # Single relayout (dim, N) -> (nq, S, dim): dim on lanes, tuples contiguous.
    # Replaces the previous repeat + gather + two transposes.
    xt = jnp.transpose(x).reshape(nq, S, dim)
    # TODO(synk): for dim < 128 a pairs-on-lanes layout would fill the vregs better;
    # production descriptors (dim >= 128) are fine with dim on lanes.

    # Tile sizing: cap one block at ~max_block_bytes so double-buffered inputs stay
    # well inside every generation's scoped-VMEM budget (v5e 16 MiB default, v7x 64 MiB
    # physical VMEM).
    bytes_per_tuple = S * dim * 4
    tb = max(1, min(nq, max_block_bytes // bytes_per_tuple))
    nb_total = -(-nq // tb)                    # total tuple blocks
    nc = 2 if nb_total >= 2 else 1             # 2-way "parallel" split -> both v7x TCs
    nb_per_split = -(-nb_total // nc)

    kernel = functools.partial(
        _contrastive_loss_kernel, margin=float(margin), eps=float(eps),
        nq=nq, tuples_per_block=tb, nb_per_split=nb_per_split)

    def x_index_map(c, b):
        # Clamp so a (possibly empty) trailing block of the second split still reads a
        # valid block; its tuples are masked out inside the kernel.
        return (jnp.minimum(c * nb_per_split + b, nb_total - 1), 0, 0)

    partials = pl.pallas_call(
        kernel,
        out_shape=jax.ShapeDtypeStruct((nc, 1, 1), jnp.float32),
        grid=(nc, nb_per_split),
        in_specs=[pl.BlockSpec((tb, S, dim), x_index_map)],
        out_specs=pl.BlockSpec((1, 1, 1), lambda c, b: (c, 0, 0)),
        scratch_shapes=[pltpu.VMEM((1, 1, 1), jnp.float32)],
        compiler_params=pltpu.CompilerParams(
            dimension_semantics=("parallel", "arbitrary"),
            vmem_limit_bytes=32 * 1024 * 1024),
    )(xt)
    return jnp.sum(partials)


def _reference_loss(x, label, margin=0.7, eps=1e-6):
    # Pure-JAX reference mirroring the PyTorch indexing, with the reviewed eps
    # placement: D = sqrt(sum(dif^2) + eps).
    x = jnp.asarray(x, jnp.float32)
    label_np = np.asarray(label, np.float32)
    dim, n = x.shape
    nq = int((label_np == -1).sum())
    S = n // nq
    x1 = jnp.repeat(x[:, ::S], S - 1, axis=1)
    idx = np.nonzero(label_np != -1)[0]
    x2 = x[:, idx]
    lbl = jnp.asarray(label_np[idx], jnp.float32)
    dif = x1 - x2
    D = jnp.sqrt(jnp.sum(dif ** 2, axis=0) + eps)
    y = 0.5 * lbl * D ** 2 + 0.5 * (1 - lbl) * jnp.maximum(margin - D, 0.0) ** 2
    return jnp.sum(y)


if __name__ == "__main__":
    margin, eps = 0.7, 1e-6

    def make_inputs(key, dim, nq, S, scale):
        x = scale * jax.random.normal(key, (dim, nq * S), dtype=jnp.float32)
        label = jnp.asarray(np.tile(
            np.concatenate([np.array([-1.0, 1.0], np.float32),
                            np.zeros(S - 2, np.float32)]), nq))
        return x, label

    k1, k2 = jax.random.split(jax.random.PRNGKey(0))

    # 1) Module docstring shape: x (128, 35) = 5 tuples of 7 images (q, p, 5 negs).
    x1, lab1 = make_inputs(k1, dim=128, nq=5, S=7, scale=0.04)
    out1 = jax.block_until_ready(contrastive_loss(x1, lab1, margin, eps))
    ref1 = jax.block_until_ready(_reference_loss(x1, lab1, margin, eps))
    np.testing.assert_allclose(np.asarray(out1), np.asarray(ref1), rtol=1e-5, atol=1e-5)

    # 2) Multi-block path: force a small tile (4 tuples/block) -> grid (2, 2) with a
    #    partial last block and a clamped/masked trailing block (exercises the
    #    parallel split, accumulator and masking).
    x2, lab2 = make_inputs(k2, dim=128, nq=9, S=7, scale=0.04)
    out2 = jax.block_until_ready(
        contrastive_loss(x2, lab2, margin, eps, max_block_bytes=4 * 7 * 128 * 4))
    ref2 = jax.block_until_ready(_reference_loss(x2, lab2, margin, eps))
    np.testing.assert_allclose(np.asarray(out2), np.asarray(ref2), rtol=1e-5, atol=1e-5)

    print("KERNEL_OK")
</pallas_src>

<mosaic_0001>
module attributes {stable_mosaic.version = 11 : i64} {
  func.func @_contrastive_loss_kernel(%arg0: i32, %arg1: i32, %arg2: memref<5x7x128xf32, #tpu.memory_space<vmem>>, %arg3: memref<1x1x1xf32, #tpu.memory_space<vmem>>, %arg4: memref<1x1x1xf32, #tpu.memory_space<vmem>>) attributes {dimension_semantics = [#tpu.dimension_semantics<parallel>, #tpu.dimension_semantics<arbitrary>], iteration_bounds = array<i64: 1, 1>, scalar_prefetch = 0 : i64, scratch_operands = 1 : i64, tpu.core_type = #tpu.core_type<tc>, window_params = [{transform_indices = @transform_0, window_bounds = array<i64: 5, 7, 128>}, {transform_indices = @transform_1, window_bounds = array<i64: 1, 1, 1>}]} {
    %c0_i32 = arith.constant 0 : i32
    %0 = arith.cmpi eq, %arg1, %c0_i32 : i32
    %1 = arith.extui %0 : i1 to i32
    %c0_i32_0 = arith.constant 0 : i32
    %2 = arith.cmpi ne, %1, %c0_i32_0 : i32
    scf.if %2 {
      %cst_21 = arith.constant 0.000000e+00 : f32
      %50 = vector.broadcast %cst_21 : f32 to vector<1x1x1xf32>
      %c0_22 = arith.constant 0 : index
      %c0_23 = arith.constant 0 : index
      %c0_24 = arith.constant 0 : index
      %51 = vector.load %arg4[%c0_22, %c0_23, %c0_24] : memref<1x1x1xf32, #tpu.memory_space<vmem>>, vector<1x1x1xf32>
      tpu.vector_store %arg4[%c0_22, %c0_23, %c0_24], %50 {strides = array<i32>} : memref<1x1x1xf32, #tpu.memory_space<vmem>>, vector<1x1x1xf32>,
    } else {
    }
    %c0 = arith.constant 0 : index
    %c0_1 = arith.constant 0 : index
    %c0_2 = arith.constant 0 : index
    %3 = vector.load %arg2[%c0, %c0_1, %c0_2] : memref<5x7x128xf32, #tpu.memory_space<vmem>>, vector<5x7x128xf32>
    %4 = vector.extract_strided_slice %3 {offsets = [0, 0, 0], sizes = [5, 1, 128], strides = [1, 1, 1]} : vector<5x7x128xf32> to vector<5x1x128xf32>
    %5 = vector.broadcast %4 : vector<5x1x128xf32> to vector<5x7x128xf32>
    %6 = arith.subf %3, %5 : vector<5x7x128xf32>
    %7 = arith.mulf %6, %6 : vector<5x7x128xf32>
    %cst = arith.constant dense<0.000000e+00> : vector<5x7xf32>
    %8 = vector.multi_reduction <add>, %7, %cst [2] : vector<5x7x128xf32> to vector<5x7xf32>
    %9 = vector.shape_cast %8 : vector<5x7xf32> to vector<5x7x1xf32>
    %cst_3 = arith.constant 9.99999997E-7 : f32
    %10 = vector.broadcast %cst_3 : f32 to vector<5x7x1xf32>
    %11 = arith.addf %9, %10 : vector<5x7x1xf32>
    %12 = math.sqrt %11 : vector<5x7x1xf32>
    %cst_4 = arith.constant 0.699999988 : f32
    %13 = vector.broadcast %cst_4 : f32 to vector<5x7x1xf32>
    %14 = arith.subf %13, %12 : vector<5x7x1xf32>
    %cst_5 = arith.constant 0.000000e+00 : f32
    %15 = vector.broadcast %cst_5 : f32 to vector<5x7x1xf32>
    %16 = arith.maximumf %14, %15 : vector<5x7x1xf32>
    %17 = tpu.iota {dimensions = array<i32: 1>} : vector<5x7x1xi32>
    %c1_i32 = arith.constant 1 : i32
    %18 = vector.broadcast %c1_i32 : i32 to vector<5x7x1xi32>
    %19 = arith.cmpi eq, %17, %18 : vector<5x7x1xi32>
    %cst_6 = arith.constant 5.000000e-01 : f32
    %20 = vector.broadcast %cst_6 : f32 to vector<5x7x1xf32>
    %21 = arith.mulf %20, %11 : vector<5x7x1xf32>
    %cst_7 = arith.constant 5.000000e-01 : f32
    %22 = vector.broadcast %cst_7 : f32 to vector<5x7x1xf32>
    %23 = arith.mulf %22, %16 : vector<5x7x1xf32>
    %24 = arith.mulf %23, %16 : vector<5x7x1xf32>
    %25 = arith.select %19, %21, %24 : vector<5x7x1xi1>, vector<5x7x1xf32>
    %26 = tpu.iota {dimensions = array<i32: 0>} : vector<5x7x1xi32>
    %c1_i32_8 = arith.constant 1 : i32
    %27 = arith.muli %arg0, %c1_i32_8 : i32
    %28 = arith.addi %27, %arg1 : i32
    %c5_i32 = arith.constant 5 : i32
    %29 = arith.muli %28, %c5_i32 : i32
    %30 = vector.broadcast %29 : i32 to vector<5x7x1xi32>
    %31 = arith.addi %30, %26 : vector<5x7x1xi32>
    %c0_i32_9 = arith.constant 0 : i32
    %32 = vector.broadcast %c0_i32_9 : i32 to vector<5x7x1xi32>
    %33 = arith.cmpi eq, %17, %32 : vector<5x7x1xi32>
    %c5_i32_10 = arith.constant 5 : i32
    %34 = vector.broadcast %c5_i32_10 : i32 to vector<5x7x1xi32>
    %35 = arith.cmpi sge, %31, %34 : vector<5x7x1xi32>
    %36 = arith.ori %33, %35 : vector<5x7x1xi1>
    %cst_11 = arith.constant 0.000000e+00 : f32
    %37 = vector.broadcast %cst_11 : f32 to vector<5x7x1xf32>
    %38 = arith.select %36, %37, %25 : vector<5x7x1xi1>, vector<5x7x1xf32>
    %c0_12 = arith.constant 0 : index
    %c0_13 = arith.constant 0 : index
    %c0_14 = arith.constant 0 : index
    %39 = vector.load %arg4[%c0_12, %c0_13, %c0_14] : memref<1x1x1xf32, #tpu.memory_space<vmem>>, vector<1x1x1xf32>
    %40 = vector.shape_cast %38 : vector<5x7x1xf32> to vector<1x5x7x1xf32>
    %cst_15 = arith.constant dense<0.000000e+00> : vector<1xf32>
    %41 = vector.multi_reduction <add>, %40, %cst_15 [1, 2, 3] : vector<1x5x7x1xf32> to vector<1xf32>
    %42 = vector.shape_cast %41 : vector<1xf32> to vector<1x1x1x1xf32>
    %43 = vector.extract %42[0, 0, 0, 0] : f32 from vector<1x1x1x1xf32>
    %44 = vector.broadcast %43 : f32 to vector<1x1x1xf32>
    %45 = arith.addf %39, %44 : vector<1x1x1xf32>
    %c0_16 = arith.constant 0 : index
    %c0_17 = arith.constant 0 : index
    %c0_18 = arith.constant 0 : index
    %46 = vector.load %arg4[%c0_16, %c0_17, %c0_18] : memref<1x1x1xf32, #tpu.memory_space<vmem>>, vector<1x1x1xf32>
    tpu.vector_store %arg4[%c0_16, %c0_17, %c0_18], %45 {strides = array<i32>} : memref<1x1x1xf32, #tpu.memory_space<vmem>>, vector<1x1x1xf32>,
    %c0_i32_19 = arith.constant 0 : i32
    %47 = arith.cmpi eq, %arg1, %c0_i32_19 : i32
    %48 = arith.extui %47 : i1 to i32
    %c0_i32_20 = arith.constant 0 : i32
    %49 = arith.cmpi ne, %48, %c0_i32_20 : i32
    scf.if %49 {
      %c0_21 = arith.constant 0 : index
      %c0_22 = arith.constant 0 : index
      %c0_23 = arith.constant 0 : index
      %50 = vector.load %arg4[%c0_21, %c0_22, %c0_23] : memref<1x1x1xf32, #tpu.memory_space<vmem>>, vector<1x1x1xf32>
      %c0_24 = arith.constant 0 : index
      %c0_25 = arith.constant 0 : index
      %c0_26 = arith.constant 0 : index
      %51 = vector.load %arg3[%c0_24, %c0_25, %c0_26] : memref<1x1x1xf32, #tpu.memory_space<vmem>>, vector<1x1x1xf32>
      tpu.vector_store %arg3[%c0_24, %c0_25, %c0_26], %50 {strides = array<i32>} : memref<1x1x1xf32, #tpu.memory_space<vmem>>, vector<1x1x1xf32>,
    } else {
    }
    return
  }
  func.func @transform_0(%arg0: i32, %arg1: i32) -> (i32, i32, i32) {
    %c1_i32 = arith.constant 1 : i32
    %0 = arith.muli %arg0, %c1_i32 : i32
    %1 = arith.addi %0, %arg1 : i32
    %c0_i32 = arith.constant 0 : i32
    %2 = arith.minsi %1, %c0_i32 : i32
    %c0_i32_0 = arith.constant 0 : i32
    %c0_i32_1 = arith.constant 0 : i32
    %c0_i32_2 = arith.constant 0 : i32
    return %2, %c0_i32_0, %c0_i32_1 : i32, i32, i32
  }
  func.func @transform_1(%arg0: i32, %arg1: i32) -> (i32, i32, i32) {
    %c0_i32 = arith.constant 0 : i32
    %c0_i32_0 = arith.constant 0 : i32
    %c0_i32_1 = arith.constant 0 : i32
    return %arg0, %c0_i32, %c0_i32_0 : i32, i32, i32
  }
}

</mosaic_0001>

<bundles_post_ra>
// kernel: tpu_custom_call.1
= control target key start
LH: loop header
LB: loop body
LE: loop exit
PB: predicated region body
PF: predicated region fallthrough
CT: control target
= control target key end

     0   :  { %6 = vsyncpa [#allocation4], 0  ;;  %s410_s0 = inlined_call_operand.hbm [shape: f32[5,7,128], index: 0, kind: input, shape index: {}]   ;;  %s411_s1 = inlined_call_operand.hbm [shape: f32[1,1,1], index: 1, kind: output, shape index: {}]  }
   0x1   :  { %7 = vsyncpa [#allocation5], 0  ;;  %s18_s8 = sshll.u32 %s410_s0, 4  ;;  %s315_s9 = smov [#allocation3]   ;;  %s19_s8 = int_to_ptr.hbm [resolvable:$true] %s18_s8 }
   0x2   :  { %s20_s10 = sshll.u32 %s315_s9, 4  ;;  %s316_s11 = smov 128   ;;  %s21_s10 = int_to_ptr.vmem [resolvable:$true] %s20_s10 }
   0x3   :  { %s317_s12 = smov 8  }
   0x4   :  { %26 = dma.hbm_to_vmem [thread:$0]  %s19_s8, 640, %s21_s10, [#allocation4], %s316_s11, %s316_s11, %s317_s12  }
   0x5   :  { %311 = dma.done.wait [#allocation4], 640  }
   0x6   :  { %312 = vsyncadd [#allocation4], 4294966656  ;;  %v45_v0 = vld [vmem:[#allocation3 + $0x20] sm:$0x7f]  ;;  %v43_v1 = vld [vmem:[#allocation3 + $0x10] sm:$0x7f]  ;;  %v152_v50 = vlaneseq }
   0x7   :  { %v41_v2 = vld [vmem:[#allocation3] sm:$0x7f]  ;;  %v50_v3 = vperm.slane %v45_v0, 0  ;;  %v48_v4 = vperm.slane %v43_v1, 0  ;;  %v44_v6 = vld [vmem:[#allocation3 + $0x18] sm:$0x7f] }
   0x8   :  { %v46_v5 = vperm.slane %v41_v2, 0  ;;  %v49_v7 = vperm.slane %v44_v6, 0  ;;  %v42_v8 = vld [vmem:[#allocation3 + $0x8] sm:$0x7f]  ;;  %vm61_vm0 = vcmask 1046528   ;;  %vm199_vm13 = vcmask 6144  }
   0x9   :  { %v55_v9 = vsub.f32 %v45_v0, %v50_v3  ;;  %v53_v10 = vsub.f32 %v43_v1, %v48_v4  ;;  %v47_v12 = vperm.slane %v42_v8, 0  ;;  %vm39_vm14 = vcmask 0   ;;  %s319_s13 = smov [#allocation6]   ;;  %s234_s17 = sshll.u32 %s411_s1, 4  ;;  %s235_s17 = int_to_ptr.hbm [resolvable:$true] %s234_s17 }
   0xa   :  { %v51_v11 = vsub.f32 %v41_v2, %v46_v5  ;;  %v54_v16 = vsub.f32 %v44_v6, %v49_v7  ;;  %s232_s14 = sshll.u32 %s319_s13, 4  ;;  %s233_s14 = int_to_ptr.vmem [resolvable:$true] %s232_s14 }
   0xb   :  { %v60_v13 = vmul.f32 %v55_v9, %v55_v9  ;;  %v58_v14 = vmul.f32 %v53_v10, %v53_v10  ;;  %v52_v17 = vsub.f32 %v42_v8, %v47_v12 }
   0xc   :  { %v56_v15 = vmul.f32 %v51_v11, %v51_v11  ;;  %v59_v21 = vmul.f32 %v54_v16, %v54_v16 }
   0xd   :  { %v74_v18 = vsel %vm61_vm0, %v60_v13, 0.0  ;;  %v68_v19 = vsel %vm61_vm0, %v58_v14, 0.0  ;;  %v57_v22 = vmul.f32 %v52_v17, %v52_v17 }
   0xe   :  { %v62_v20 = vsel %vm61_vm0, %v56_v15, 0.0  ;;  %75 = vadd.xlane.f32.xlu2 %v74_v18  ;;  %69 = vadd.xlane.f32.xlu1 %v68_v19  ;;  %v71_v23 = vsel %vm61_vm0, %v59_v21, 0.0 }
   0xf   :  { %63 = vadd.xlane.f32.xlu0 %v62_v20  ;;  %v65_v24 = vsel %vm61_vm0, %v57_v22, 0.0  ;;  %v153_v20 = vshrl.u32 %v152_v50, 7 }
  0x11   :  { %vm154_vm11 = vcmp.eq.s32.totalorder %v153_v20, 1  ;;  %vm182_vm12 = vcmp.eq.s32.totalorder %v153_v20, 0 }
  0x16   :  { %72 = vadd.xlane.f32.xlu1 %v71_v23 }
  0x17   :  { %66 = vadd.xlane.f32.xlu0 %v65_v24 }
  0x81   :  { %v76_v25 = vpop.xlane.xlu2 %75  ;;  %v70_v26 = vpop.xlane.xlu1 %69 }
  0x82   :  { %v333_v27 = vadd.f32 1e-06, %v76_v25  ;;  %v335_v28 = vadd.f32 1e-06, %v70_v26  ;;  %v64_v29 = vpop.xlane.xlu0 %63 }
  0x83   :  { %v337_v30 = vadd.f32 1e-06, %v64_v29 }
  0x84   :  { %253 = vrsqrt.f32 %v333_v27  ;;  %vm113_vm1 = vcmp.eq.f32.partialorder %v335_v28, inf  ;;  %vm115_vm2 = vcmp.eq.f32.partialorder %v335_v28, 0.0  ;;  %v116_v56 = vand.u32 2147483648, %v335_v28 }
  0x85   :  { %255 = vrsqrt.f32 %v335_v28  ;;  %vm89_vm3 = vcmp.eq.f32.partialorder %v337_v30, inf  ;;  %vm91_vm4 = vcmp.eq.f32.partialorder %v337_v30, 0.0  ;;  %v92_v60 = vand.u32 2147483648, %v337_v30 }
  0x86   :  { %257 = vrsqrt.f32 %v337_v30  ;;  %vm137_vm5 = vcmp.eq.f32.partialorder %v333_v27, inf  ;;  %v140_v2 = vand.u32 2147483648, %v333_v27  ;;  %vm139_vm6 = vcmp.eq.f32.partialorder %v333_v27, 0.0 }
  0x89   :  { %v73_v31 = vpop.xlane.xlu1 %72 }
  0x8a   :  { %v254_v32 = vpop.eup %253  ;;  %v342_v33 = vadd.f32 1e-06, %v73_v31  ;;  %v67_v34 = vpop.xlane.xlu0 %66 }
  0x8b   :  { %v256_v35 = vpop.eup %255  ;;  %v344_v36 = vadd.f32 1e-06, %v67_v34  ;;  %v131_v37 = vmul.f32 %v254_v32, %v333_v27 }
  0x8c   :  { %v258_v38 = vpop.eup %257  ;;  %259 = vrsqrt.f32 %v342_v33  ;;  %v107_v39 = vmul.f32 %v256_v35, %v335_v28  ;;  %vm125_vm7 = vcmp.eq.f32.partialorder %v342_v33, inf  ;;  %vm127_vm9 = vcmp.eq.f32.partialorder %v342_v33, 0.0 }
  0x8d   :  { %261 = vrsqrt.f32 %v344_v36  ;;  %v83_v40 = vmul.f32 %v258_v38, %v337_v30  ;;  %v132_v42 = vmul.f32 %v254_v32, %v131_v37  ;;  %vm101_vm8 = vcmp.eq.f32.partialorder %v344_v36, inf }
  0x8e   :  { %v108_v41 = vmul.f32 %v256_v35, %v107_v39  ;;  %v128_v22 = vand.u32 2147483648, %v342_v33  ;;  %vm103_vm10 = vcmp.eq.f32.partialorder %v344_v36, 0.0  ;;  %v104_v23 = vand.u32 2147483648, %v344_v36 }
  0x8f   :  { %v84_v43 = vmul.f32 %v258_v38, %v83_v40  ;;  %v133_v45 = vmul.f32 0.5, %v132_v42  ;;  %v158_v50 = vmul.f32 0.5, %v342_v33 }
  0x90   :  { %v109_v44 = vmul.f32 0.5, %v108_v41  ;;  %v155_v41 = vmul.f32 0.5, %v337_v30 }
  0x91   :  { %v85_v46 = vmul.f32 0.5, %v84_v43  ;;  %v134_v49 = vsub.f32 1.5, %v133_v45  ;;  %v157_v45 = vmul.f32 0.5, %v335_v28 }
  0x92   :  { %v260_v47 = vpop.eup %259  ;;  %v110_v48 = vsub.f32 1.5, %v109_v44 }
  0x93   :  { %v262_v51 = vpop.eup %261  ;;  %v86_v52 = vsub.f32 1.5, %v85_v46  ;;  %v119_v53 = vmul.f32 %v260_v47, %v342_v33  ;;  %v135_v57 = vmul.f32 %v254_v32, %v134_v49 }
  0x94   :  { %v95_v54 = vmul.f32 %v262_v51, %v344_v36  ;;  %v111_v55 = vmul.f32 %v256_v35, %v110_v48  ;;  %v156_v48 = vmul.f32 0.5, %v344_v36 }
  0x95   :  { %v87_v58 = vmul.f32 %v258_v38, %v86_v52  ;;  %v120_v59 = vmul.f32 %v260_v47, %v119_v53  ;;  %v136_v63 = vmul.f32 %v135_v57, %v333_v27 }
  0x96   :  { %v96_v61 = vmul.f32 %v262_v51, %v95_v54  ;;  %v112_v62 = vmul.f32 %v111_v55, %v335_v28  ;;  %v159_v54 = vmul.f32 0.5, %v333_v27 }
  0x97   :  { %v88_v0 = vmul.f32 %v87_v58, %v337_v30  ;;  %v121_v1 = vmul.f32 0.5, %v120_v59  ;;  %v138_v5 = vsel %vm137_vm5, %v333_v27, %v136_v63 }
  0x98   :  { %v97_v3 = vmul.f32 0.5, %v96_v61  ;;  %v114_v4 = vsel %vm113_vm1, %v335_v28, %v112_v62  ;;  %v141_v9 = vsel %vm139_vm6, %v140_v2, %v138_v5 }
  0x99   :  { %v90_v6 = vsel %vm89_vm3, %v337_v30, %v88_v0  ;;  %v117_v7 = vsel %vm115_vm2, %v116_v56, %v114_v4  ;;  %v122_v8 = vsub.f32 1.5, %v121_v1  ;;  %v146_v16 = vsub.f32 0.7, %v141_v9 }
  0x9a   :  { %v93_v10 = vsel %vm91_vm4, %v92_v60, %v90_v6  ;;  %v98_v11 = vsub.f32 1.5, %v97_v3  ;;  %v144_v12 = vsub.f32 0.7, %v117_v7  ;;  %v318_v3 = vmov 0.0  }
  0x9b   :  { %v123_v13 = vmul.f32 %v260_v47, %v122_v8  ;;  %v142_v14 = vsub.f32 0.7, %v93_v10  ;;  %v151_v31 = vmax.f32 %v146_v16, 0.0  ;;  %40 = vst.msk [vmem:[#allocation2] sm:$0x1] %vm39_vm14, %v318_v3 }
  0x9c   :  { %v99_v15 = vmul.f32 %v262_v51, %v98_v11  ;;  %v149_v17 = vmax.f32 %v144_v12, 0.0 }
  0x9d   :  { %v124_v18 = vmul.f32 %v123_v13, %v342_v33  ;;  %v147_v19 = vmax.f32 %v142_v14, 0.0  ;;  %v164_v42 = vmul.f32 0.5, %v151_v31 }
  0x9e   :  { %v100_v21 = vmul.f32 %v99_v15, %v344_v36  ;;  %v162_v32 = vmul.f32 0.5, %v149_v17 }
  0x9f   :  { %v126_v24 = vsel %vm125_vm7, %v342_v33, %v124_v18  ;;  %v160_v25 = vmul.f32 0.5, %v147_v19  ;;  %v169_v52 = vmul.f32 %v164_v42, %v151_v31 }
  0xa0   :  { %v102_v26 = vsel %vm101_vm8, %v344_v36, %v100_v21  ;;  %v129_v29 = vsel %vm127_vm9, %v128_v22, %v126_v24  ;;  %v167_v43 = vmul.f32 %v162_v32, %v149_v17 }
  0xa1   :  { %v105_v34 = vsel %vm103_vm10, %v104_v23, %v102_v26  ;;  %v145_v35 = vsub.f32 0.7, %v129_v29  ;;  %v165_v38 = vmul.f32 %v160_v25, %v147_v19  ;;  %v174_v57 = vsel %vm154_vm11, %v159_v54, %v169_v52 }
  0xa2   :  { %v143_v37 = vsub.f32 0.7, %v105_v34  ;;  %v172_v53 = vsel %vm154_vm11, %v157_v45, %v167_v43  ;;  %v197_v27 = vsel %vm182_vm12, 0.0, %v174_v57  ;;  %v198_v11 = vld [vmem:[#allocation2] sm:$0x1] }
  0xa3   :  { %v150_v39 = vmax.f32 %v145_v35, 0.0  ;;  %v170_v47 = vsel %vm154_vm11, %v155_v41, %v165_v38  ;;  %v195_v36 = vsel %vm182_vm12, 0.0, %v172_v53  ;;  %v207_v1 = vsel %vm199_vm13, %v197_v27, 0.0 }
  0xa4   :  { %v148_v40 = vmax.f32 %v143_v37, 0.0  ;;  %v193_v30 = vsel %vm182_vm12, 0.0, %v170_v47  ;;  %v203_v61 = vsel %vm199_vm13, %v195_v36, 0.0 }
  0xa5   :  { %v163_v44 = vmul.f32 0.5, %v150_v39  ;;  %v200_v33 = vsel %vm199_vm13, %v193_v30, 0.0 }
  0xa6   :  { %v161_v46 = vmul.f32 0.5, %v148_v40 }
  0xa7   :  { %v168_v49 = vmul.f32 %v163_v44, %v150_v39 }
  0xa8   :  { %v166_v51 = vmul.f32 %v161_v46, %v148_v40 }
  0xa9   :  { %v173_v55 = vsel %vm154_vm11, %v158_v50, %v168_v49 }
  0xaa   :  { %v171_v28 = vsel %vm154_vm11, %v156_v48, %v166_v51  ;;  %v196_v59 = vsel %vm182_vm12, 0.0, %v173_v55 }
  0xab   :  { %v194_v56 = vsel %vm182_vm12, 0.0, %v171_v28  ;;  %v205_v63 = vsel %vm199_vm13, %v196_v59, 0.0 }
  0xac   :  { %v201_v58 = vsel %vm199_vm13, %v194_v56, 0.0 }
  0xad   :  { %v202_v60 = vadd.f32 %v201_v58, %v200_v33 }
  0xaf   :  { %v204_v62 = vadd.f32 %v203_v61, %v202_v60 }
  0xb1   :  { %v206_v0 = vadd.f32 %v205_v63, %v204_v62 }
  0xb3   :  { %v208_v2 = vadd.f32 %v207_v1, %v206_v0 }
  0xb5   :  { %209 = vadd.xlane.f32.xlu2 %v208_v2 }
 0x128   :  { %v210_v4 = vpop.xlane.xlu2 %209 }
 0x129   :  { %v211_v5 = vrot.slane %v210_v4, 4 }
 0x12b   :  { %v212_v6 = vadd.f32 %v211_v5, %v210_v4 }
 0x12d   :  { %v213_v7 = vrot.slane %v212_v6, 2 }
 0x12f   :  { %v214_v8 = vadd.f32 %v213_v7, %v212_v6 }
 0x131   :  { %v215_v9 = vrot.slane %v214_v8, 1 }
 0x133   :  { %v216_v10 = vadd.f32 %v215_v9, %v214_v8 }
 0x135   :  { %246 = vpush %v216_v10 }
 0x166   :  { %s247_s0 = spop %246 }
 0x167   :  { %v218_v12 = vstv %s247_s0 }
 0x168   :  { %v219_v13 = vadd.f32 %v218_v12, %v198_v11 }
 0x16a   :  { %221 = vst.msk [vmem:[#allocation2] sm:$0x1] %vm39_vm14, %v219_v13 }
 0x171   :  { %v225_v14 = vld [vmem:[#allocation2] sm:$0x1] }
 0x172   :  { %226 = vst.msk [vmem:[#allocation6] sm:$0x1] %vm39_vm14, %v225_v14 }
 0x173   :  { %237 = dma.vmem_to_hbm [thread:$0]  %s233_s14, 16, %s235_s17, [#allocation5]  }
 0x174   :  { %313 = dma.done.wait [#allocation5], 16  }
 0x175   :  { %314 = vsyncadd [#allocation5], 4294967280 }
 0x176   :  { %242 = vsyncpa [#allocation4], 1 }
 0x177   :  { %243 = vsyncpa [#allocation5], 1 }

</bundles_post_ra>
